<compile_context>
chip_gen: v7x
topology: tpu7x:2x2x1
jax: 0.10.0
libtpu: 0.0.40
codegen_flags: <defaults>
</compile_context>

<pallas_src>
import functools

import numpy as np
import jax
import jax.numpy as jnp
from jax.experimental import pallas as pl
from jax.experimental.pallas import tpu as pltpu


NUM_CLASSES = 10
CLS_PAD = 128            # lane-dense padded classifier width (sliced back to 10)


# ----------------------------- Pallas kernel -------------------------------

def head_kernel(x_ref, wc_ref, bc_ref, w1_ref, b1_ref, w2_ref, b2_ref,
                w3_ref, b3_ref, o_ref, pooled_ref, *, n, hw):
    """Fused conv1(1x1)+BN+ReLU -> AvgPool2d(2) -> lin1+ReLU -> lin2+ReLU -> cls."""
    # 1x1 conv as a channel matmul (BN folded into weight/bias), then ReLU.
    h = jnp.dot(x_ref[...], wc_ref[...], preferred_element_type=jnp.float32)
    h = jnp.maximum(h + bc_ref[...], 0.0)                       # (n*hw, 64) f32

    # AvgPool2d(2): 2x2 spatial -> 1x1 == mean over each sample's hw rows.
    # (VPU/XLU reduce; no pooling matrix, no MXU zeros.)
    for i in range(n):
        pooled_ref[i:i + 1, :] = jnp.mean(h[i * hw:(i + 1) * hw, :],
                                          axis=0, keepdims=True)
    flat = pooled_ref[...].astype(jnp.bfloat16)                 # == x.view(N, -1)

    # linear1 + ReLU   (Dropout(0.5) is identity in eval mode)
    a1 = jnp.dot(flat, w1_ref[...], preferred_element_type=jnp.float32)
    a1 = jnp.maximum(a1 + b1_ref[...], 0.0).astype(jnp.bfloat16)

    # linear2 + ReLU   (Dropout(0.25) is identity in eval mode)
    a2 = jnp.dot(a1, w2_ref[...], preferred_element_type=jnp.float32)
    a2 = jnp.maximum(a2 + b2_ref[...], 0.0).astype(jnp.bfloat16)

    # classifier (output padded to 128 lanes -> lane-dense store)
    o_ref[...] = (jnp.dot(a2, w3_ref[...], preferred_element_type=jnp.float32)
                  + b3_ref[...])


# --------------------------- Params & weight prep --------------------------

def init_params(key, c_in):
    """Parameters in PyTorch layout ((out, in) linear weights, NCHW conv)."""
    ks = jax.random.split(key, 12)
    p = {}
    p["conv1_w"] = 0.1 * jax.random.normal(ks[0], (64, c_in, 1, 1), jnp.float32)
    p["conv1_b"] = 0.1 * jax.random.normal(ks[1], (64,), jnp.float32)
    p["bn_gamma"] = 1.0 + 0.1 * jax.random.normal(ks[2], (64,), jnp.float32)
    p["bn_beta"] = 0.1 * jax.random.normal(ks[3], (64,), jnp.float32)
    p["bn_mean"] = 0.1 * jax.random.normal(ks[4], (64,), jnp.float32)
    p["bn_var"] = jnp.abs(1.0 + 0.1 * jax.random.normal(ks[5], (64,), jnp.float32))
    p["lin1_w"] = 0.1 * jax.random.normal(ks[6], (512, 64), jnp.float32)
    p["lin1_b"] = 0.1 * jax.random.normal(ks[7], (512,), jnp.float32)
    p["lin2_w"] = 0.1 * jax.random.normal(ks[8], (512, 512), jnp.float32)
    p["lin2_b"] = 0.1 * jax.random.normal(ks[9], (512,), jnp.float32)
    p["cls_w"] = 0.1 * jax.random.normal(ks[10], (NUM_CLASSES, 512), jnp.float32)
    p["cls_b"] = 0.1 * jax.random.normal(ks[11], (NUM_CLASSES,), jnp.float32)
    return p


def prepare_head_weights(params, eps=1e-5):
    """One-time prep: fold BN, pre-transpose to (in, out), cast to bf16, pad cls."""
    c_in = params["conv1_w"].shape[1]
    s = params["bn_gamma"] / jnp.sqrt(params["bn_var"] + eps)          # (64,)
    t = params["bn_beta"] - params["bn_mean"] * s                       # (64,)
    wc = (params["conv1_w"].reshape(64, c_in).T * s[None, :]).astype(jnp.bfloat16)
    bc = (params["conv1_b"] * s + t).reshape(1, 64).astype(jnp.float32)

    w1 = params["lin1_w"].T.astype(jnp.bfloat16)                        # (64, 512)
    b1 = params["lin1_b"].reshape(1, 512).astype(jnp.float32)
    w2 = params["lin2_w"].T.astype(jnp.bfloat16)                        # (512, 512)
    b2 = params["lin2_b"].reshape(1, 512).astype(jnp.float32)

    w3 = jnp.zeros((512, CLS_PAD), jnp.float32)
    w3 = w3.at[:, :NUM_CLASSES].set(params["cls_w"].T).astype(jnp.bfloat16)
    b3 = jnp.zeros((1, CLS_PAD), jnp.float32).at[0, :NUM_CLASSES].set(params["cls_b"])
    return dict(wc=wc, bc=bc, w1=w1, b1=b1, w2=w2, b2=b2, w3=w3, b3=b3)


# --------------------------------- Forward ---------------------------------

def cifar10_head_forward(x_nchw, prep):
    """x_nchw: backbone output in PyTorch NCHW layout, (N, C_b, 2, 2)."""
    n, c, hgt, wid = x_nchw.shape
    hw = hgt * wid
    # NCHW -> rows (n, h, w) x channels, cast once to bf16 for the MXU.
    x2d = jnp.transpose(x_nchw, (0, 2, 3, 1)).reshape(n * hw, c).astype(jnp.bfloat16)

    out_pad = pl.pallas_call(
        functools.partial(head_kernel, n=n, hw=hw),
        out_shape=jax.ShapeDtypeStruct((n, CLS_PAD), jnp.float32),
        scratch_shapes=[pltpu.VMEM((n, 64), jnp.float32)],
    )(x2d, prep["wc"], prep["bc"], prep["w1"], prep["b1"],
      prep["w2"], prep["b2"], prep["w3"], prep["b3"])

    return out_pad[:, :NUM_CLASSES]


# ------------------------------ Pure-JAX reference -------------------------

def reference_forward(x_nchw, params, eps=1e-5):
    """f32 reference matching PyTorch eval semantics."""
    n, c, hgt, wid = x_nchw.shape
    y = jnp.einsum("nchw,oc->nohw", x_nchw, params["conv1_w"].reshape(64, c))
    y = y + params["conv1_b"][None, :, None, None]
    s = params["bn_gamma"] / jnp.sqrt(params["bn_var"] + eps)
    t = params["bn_beta"] - params["bn_mean"] * s
    y = jnp.maximum(y * s[None, :, None, None] + t[None, :, None, None], 0.0)
    y = y.reshape(n, 64, hgt // 2, 2, wid // 2, 2).mean(axis=(3, 5))   # AvgPool2d(2)
    flat = y.reshape(n, -1)                                            # (n, 64)
    h1 = jnp.maximum(flat @ params["lin1_w"].T + params["lin1_b"], 0.0)
    h2 = jnp.maximum(h1 @ params["lin2_w"].T + params["lin2_b"], 0.0)
    return h2 @ params["cls_w"].T + params["cls_b"]


if __name__ == "__main__":
    # Backbone output: spatial must be 2x2 so that AvgPool2d(2) -> 1x1 and the
    # flatten gives 64 features (== linear1.in_features). C_b is arbitrary.
    N, C_B, H, W = 2, 32, 2, 2

    key = jax.random.PRNGKey(0)
    kx, kp = jax.random.split(key)
    x = jax.random.normal(kx, (N, C_B, H, W), jnp.float32)   # backbone features
    params = init_params(kp, C_B)
    prep = prepare_head_weights(params)

    fwd = jax.jit(cifar10_head_forward)
    logits = jax.block_until_ready(fwd(x, prep))
    assert logits.shape == (N, NUM_CLASSES), logits.shape

    ref = jax.block_until_ready(reference_forward(x, params))
    # bf16 weight streaming (f32 accumulation) -> small deviation from f32 ref.
    np.testing.assert_allclose(np.asarray(logits), np.asarray(ref),
                               rtol=2e-2, atol=2e-2)

    print("KERNEL_OK")
</pallas_src>

<mosaic_0001>
module attributes {stable_mosaic.version = 11 : i64} {
  func.func @head_kernel(%arg0: memref<8x32xbf16, #tpu.memory_space<vmem>>, %arg1: memref<32x64xbf16, #tpu.memory_space<vmem>>, %arg2: memref<1x64xf32, #tpu.memory_space<vmem>>, %arg3: memref<64x512xbf16, #tpu.memory_space<vmem>>, %arg4: memref<1x512xf32, #tpu.memory_space<vmem>>, %arg5: memref<512x512xbf16, #tpu.memory_space<vmem>>, %arg6: memref<1x512xf32, #tpu.memory_space<vmem>>, %arg7: memref<512x128xbf16, #tpu.memory_space<vmem>>, %arg8: memref<1x128xf32, #tpu.memory_space<vmem>>, %arg9: memref<2x128xf32, #tpu.memory_space<vmem>>, %arg10: memref<2x64xf32, #tpu.memory_space<vmem>>) attributes {dimension_semantics = [], scalar_prefetch = 0 : i64, scratch_operands = 1 : i64, tpu.core_type = #tpu.core_type<tc>} {
    %c0 = arith.constant 0 : index
    %c0_0 = arith.constant 0 : index
    %0 = vector.load %arg0[%c0, %c0_0] : memref<8x32xbf16, #tpu.memory_space<vmem>>, vector<8x32xbf16>
    %c0_1 = arith.constant 0 : index
    %c0_2 = arith.constant 0 : index
    %1 = vector.load %arg1[%c0_1, %c0_2] : memref<32x64xbf16, #tpu.memory_space<vmem>>, vector<32x64xbf16>
    %cst = arith.constant dense<0.000000e+00> : vector<8x64xf32>
    %2 = tpu.matmul %0, %1, %cst {dimension_numbers = #tpu.dot_dimension_numbers<[1], [0], [0], [1], [0, 0, 1, 1], [], []>} : vector<8x32xbf16>, vector<32x64xbf16>, vector<8x64xf32> -> vector<8x64xf32>
    %c0_3 = arith.constant 0 : index
    %c0_4 = arith.constant 0 : index
    %3 = vector.load %arg2[%c0_3, %c0_4] : memref<1x64xf32, #tpu.memory_space<vmem>>, vector<1x64xf32>
    %4 = vector.broadcast %3 : vector<1x64xf32> to vector<8x64xf32>
    %5 = arith.addf %2, %4 : vector<8x64xf32>
    %cst_5 = arith.constant 0.000000e+00 : f32
    %6 = vector.broadcast %cst_5 : f32 to vector<8x64xf32>
    %7 = arith.maximumf %5, %6 : vector<8x64xf32>
    %8 = vector.extract_strided_slice %7 {offsets = [0, 0], sizes = [4, 64], strides = [1, 1]} : vector<8x64xf32> to vector<4x64xf32>
    %cst_6 = arith.constant dense<0.000000e+00> : vector<64xf32>
    %9 = vector.multi_reduction <add>, %8, %cst_6 [0] : vector<4x64xf32> to vector<64xf32>
    %10 = vector.shape_cast %9 : vector<64xf32> to vector<1x64xf32>
    %cst_7 = arith.constant 4.000000e+00 : f32
    %11 = vector.broadcast %cst_7 : f32 to vector<1x64xf32>
    %12 = arith.divf %10, %11 : vector<1x64xf32>
    %c0_8 = arith.constant 0 : index
    %c0_9 = arith.constant 0 : index
    %13 = vector.load %arg10[%c0_8, %c0_9] : memref<2x64xf32, #tpu.memory_space<vmem>>, vector<1x64xf32>
    tpu.vector_store %arg10[%c0_8, %c0_9], %12 {strides = array<i32>} : memref<2x64xf32, #tpu.memory_space<vmem>>, vector<1x64xf32>,
    %14 = vector.extract_strided_slice %7 {offsets = [4, 0], sizes = [4, 64], strides = [1, 1]} : vector<8x64xf32> to vector<4x64xf32>
    %cst_10 = arith.constant dense<0.000000e+00> : vector<64xf32>
    %15 = vector.multi_reduction <add>, %14, %cst_10 [0] : vector<4x64xf32> to vector<64xf32>
    %16 = vector.shape_cast %15 : vector<64xf32> to vector<1x64xf32>
    %cst_11 = arith.constant 4.000000e+00 : f32
    %17 = vector.broadcast %cst_11 : f32 to vector<1x64xf32>
    %18 = arith.divf %16, %17 : vector<1x64xf32>
    %c1 = arith.constant 1 : index
    %c0_12 = arith.constant 0 : index
    %19 = vector.load %arg10[%c1, %c0_12] : memref<2x64xf32, #tpu.memory_space<vmem>>, vector<1x64xf32>
    tpu.vector_store %arg10[%c1, %c0_12], %18 {strides = array<i32>} : memref<2x64xf32, #tpu.memory_space<vmem>>, vector<1x64xf32>,
    %c0_13 = arith.constant 0 : index
    %c0_14 = arith.constant 0 : index
    %20 = vector.load %arg10[%c0_13, %c0_14] : memref<2x64xf32, #tpu.memory_space<vmem>>, vector<2x64xf32>
    %21 = arith.truncf %20 : vector<2x64xf32> to vector<2x64xbf16>
    %c0_15 = arith.constant 0 : index
    %c0_16 = arith.constant 0 : index
    %22 = vector.load %arg3[%c0_15, %c0_16] : memref<64x512xbf16, #tpu.memory_space<vmem>>, vector<64x512xbf16>
    %cst_17 = arith.constant dense<0.000000e+00> : vector<2x512xf32>
    %23 = tpu.matmul %21, %22, %cst_17 {dimension_numbers = #tpu.dot_dimension_numbers<[1], [0], [0], [1], [0, 0, 1, 1], [], []>} : vector<2x64xbf16>, vector<64x512xbf16>, vector<2x512xf32> -> vector<2x512xf32>
    %c0_18 = arith.constant 0 : index
    %c0_19 = arith.constant 0 : index
    %24 = vector.load %arg4[%c0_18, %c0_19] : memref<1x512xf32, #tpu.memory_space<vmem>>, vector<1x512xf32>
    %25 = vector.broadcast %24 : vector<1x512xf32> to vector<2x512xf32>
    %26 = arith.addf %23, %25 : vector<2x512xf32>
    %cst_20 = arith.constant 0.000000e+00 : f32
    %27 = vector.broadcast %cst_20 : f32 to vector<2x512xf32>
    %28 = arith.maximumf %26, %27 : vector<2x512xf32>
    %29 = arith.truncf %28 : vector<2x512xf32> to vector<2x512xbf16>
    %c0_21 = arith.constant 0 : index
    %c0_22 = arith.constant 0 : index
    %30 = vector.load %arg5[%c0_21, %c0_22] : memref<512x512xbf16, #tpu.memory_space<vmem>>, vector<512x512xbf16>
    %cst_23 = arith.constant dense<0.000000e+00> : vector<2x512xf32>
    %31 = tpu.matmul %29, %30, %cst_23 {dimension_numbers = #tpu.dot_dimension_numbers<[1], [0], [0], [1], [0, 0, 1, 1], [], []>} : vector<2x512xbf16>, vector<512x512xbf16>, vector<2x512xf32> -> vector<2x512xf32>
    %c0_24 = arith.constant 0 : index
    %c0_25 = arith.constant 0 : index
    %32 = vector.load %arg6[%c0_24, %c0_25] : memref<1x512xf32, #tpu.memory_space<vmem>>, vector<1x512xf32>
    %33 = vector.broadcast %32 : vector<1x512xf32> to vector<2x512xf32>
    %34 = arith.addf %31, %33 : vector<2x512xf32>
    %cst_26 = arith.constant 0.000000e+00 : f32
    %35 = vector.broadcast %cst_26 : f32 to vector<2x512xf32>
    %36 = arith.maximumf %34, %35 : vector<2x512xf32>
    %37 = arith.truncf %36 : vector<2x512xf32> to vector<2x512xbf16>
    %c0_27 = arith.constant 0 : index
    %c0_28 = arith.constant 0 : index
    %38 = vector.load %arg7[%c0_27, %c0_28] : memref<512x128xbf16, #tpu.memory_space<vmem>>, vector<512x128xbf16>
    %cst_29 = arith.constant dense<0.000000e+00> : vector<2x128xf32>
    %39 = tpu.matmul %37, %38, %cst_29 {dimension_numbers = #tpu.dot_dimension_numbers<[1], [0], [0], [1], [0, 0, 1, 1], [], []>} : vector<2x512xbf16>, vector<512x128xbf16>, vector<2x128xf32> -> vector<2x128xf32>
    %c0_30 = arith.constant 0 : index
    %c0_31 = arith.constant 0 : index
    %40 = vector.load %arg8[%c0_30, %c0_31] : memref<1x128xf32, #tpu.memory_space<vmem>>, vector<1x128xf32>
    %41 = vector.broadcast %40 : vector<1x128xf32> to vector<2x128xf32>
    %42 = arith.addf %39, %41 : vector<2x128xf32>
    %c0_32 = arith.constant 0 : index
    %c0_33 = arith.constant 0 : index
    %43 = vector.load %arg9[%c0_32, %c0_33] : memref<2x128xf32, #tpu.memory_space<vmem>>, vector<2x128xf32>
    tpu.vector_store %arg9[%c0_32, %c0_33], %42 {strides = array<i32>} : memref<2x128xf32, #tpu.memory_space<vmem>>, vector<2x128xf32>,
    return
  }
}

</mosaic_0001>

<bundles_post_ra>
// kernel: cifar10_head_forward.1
= control target key start
LH: loop header
LB: loop body
LE: loop exit
PB: predicated region body
PF: predicated region fallthrough
CT: control target
= control target key end

     0   :  { %14 = vsyncpa [#allocation4], 0  ;;  %s2477_s0 = inlined_call_operand.vmem [shape: bf16[8,32], index: 0, kind: input, shape index: {}]   ;;  %s2478_s1 = inlined_call_operand.vmem [shape: bf16[32,64], index: 1, kind: input, shape index: {}]   ;;  %s2479_s2 = inlined_call_operand.vmem [shape: f32[1,64], index: 2, kind: input, shape index: {}]   ;;  %s2480_s3 = inlined_call_operand.hbm [shape: bf16[64,512], index: 3, kind: input, shape index: {}]   ;;  %s2481_s4 = inlined_call_operand.vmem [shape: f32[1,512], index: 4, kind: input, shape index: {}]   ;;  %s2482_s5 = inlined_call_operand.hbm [shape: bf16[512,512], index: 5, kind: input, shape index: {}]   ;;  %s2483_s6 = inlined_call_operand.vmem [shape: f32[1,512], index: 6, kind: input, shape index: {}]   ;;  %s2484_s7 = inlined_call_operand.hbm [shape: bf16[512,128], index: 7, kind: input, shape index: {}]   ;;  %s2485_s8 = inlined_call_operand.vmem [shape: f32[1,128], index: 8, kind: input, shape index: {}]   ;;  %s2486_s9 = inlined_call_operand.hbm [shape: f32[2,128], index: 9, kind: output, shape index: {}]  }
   0x1   :  { %15 = vsyncpa [#allocation7], 0 }
   0x2   :  { %16 = vsyncpa [#allocation5], 0  ;;  %s2309_s30 = smov [#allocation6]   ;;  %s2310_s11 = smov [#allocation3]  }
   0x3   :  { %s42_s10 = sshll.u32 %s2309_s30, 4  ;;  %s28_s12 = sshll.u32 %s2310_s11, 4  ;;  %s43_s10 = int_to_ptr.vmem [resolvable:$true] %s42_s10  ;;  %s2370_s12 = int_to_ptr.vmem [resolvable:$true] %s28_s12 }
   0x4   :  { %s2215_s15 = scalar_lea.hbm %s2482_s5, 16384 }
   0x5   :  { %p2216_p0 = scmp.ne.s32.totalorder %s2482_s5, %s2215_s15  ;;  %p2219_p1 = scmp.lt.u32.totalorder %s2215_s15, %s2482_s5 }
   0x7   :  { %p2221_p2 = pnand %p2219_p1, %p2216_p0 }
   0x9   :  { %2224 = shalt.err (!%p2221_p2)
}
   0xa   :  { %s2225_s20 = scalar_lea.vmem %s43_s10, 16384  ;;  %p2230_p4 = scmp.lt.s32.totalorder %s43_s10, %s43_s10 }
   0xb   :  { %p2226_p3 = scmp.ne.s32.totalorder %s43_s10, %s2225_s20  ;;  %p2231_p5 = scmp.lt.s32.totalorder %s2225_s20, %s2225_s20 }
   0xd   :  { %p2232_p6 = por %p2231_p5, %p2230_p4 }
   0xf   :  { %p2233_p7 = pnand %p2232_p6, %p2226_p3 }
  0x11   :  { %2236 = shalt.err (!%p2233_p7)
}
  0x12   :  { %s2311_s21 = smov 256   ;;  %s2312_s22 = smov 16  }
  0x13   :  { %48 = dma.hbm_to_vmem [thread:$0]  %s2482_s5, 16384, %s43_s10, [#allocation7], %s2311_s21, %s2311_s21, %s2312_s22  }
  0x14   :  { %s2237_s27 = scalar_lea.hbm %s2480_s3, 2048 }
  0x15   :  { %p2238_p8 = scmp.ne.s32.totalorder %s2480_s3, %s2237_s27  ;;  %p2241_p9 = scmp.lt.u32.totalorder %s2237_s27, %s2480_s3 }
  0x17   :  { %p2243_p10 = pnand %p2241_p9, %p2238_p8 }
  0x19   :  { %2246 = shalt.err (!%p2243_p10)
}
  0x1a   :  { %s2247_s13 = scalar_lea.vmem %s2370_s12, 2048  ;;  %p2252_p12 = scmp.lt.s32.totalorder %s2370_s12, %s2370_s12 }
  0x1b   :  { %p2248_p11 = scmp.ne.s32.totalorder %s2370_s12, %s2247_s13  ;;  %p2253_p13 = scmp.lt.s32.totalorder %s2247_s13, %s2247_s13 }
  0x1d   :  { %p2254_p0 = por %p2253_p13, %p2252_p12 }
  0x1f   :  { %p2255_p1 = pnand %p2254_p0, %p2248_p11 }
  0x21   :  { %2258 = shalt.err (!%p2255_p1)
}
  0x22   :  { %34 = dma.hbm_to_vmem [thread:$0]  %s2480_s3, 2048, %s2370_s12, [#allocation4], %s2311_s21, %s2311_s21, %s2312_s22  }
  0x23   :  { %s2313_s14 = smov [#allocation8]   ;;  %s2259_s18 = scalar_lea.hbm %s2484_s7, 4096 }
  0x24   :  { %s56_s15 = sshll.u32 %s2313_s14, 4  ;;  %p2260_p2 = scmp.ne.s32.totalorder %s2484_s7, %s2259_s18  ;;  %s57_s15 = int_to_ptr.vmem [resolvable:$true] %s56_s15 }
  0x25   :  { %p2263_p3 = scmp.lt.u32.totalorder %s2259_s18, %s2484_s7 }
  0x27   :  { %p2265_p4 = pnand %p2263_p3, %p2260_p2 }
  0x29   :  { %2268 = shalt.err (!%p2265_p4)
}
  0x2a   :  { %s2269_s25 = scalar_lea.vmem %s57_s15, 4096  ;;  %p2274_p6 = scmp.lt.s32.totalorder %s57_s15, %s57_s15 }
  0x2b   :  { %p2270_p5 = scmp.ne.s32.totalorder %s57_s15, %s2269_s25  ;;  %p2275_p7 = scmp.lt.s32.totalorder %s2269_s25, %s2269_s25 }
  0x2d   :  { %p2276_p8 = por %p2275_p7, %p2274_p6 }
  0x2f   :  { %p2277_p9 = pnand %p2276_p8, %p2270_p5 }
  0x31   :  { %2280 = shalt.err (!%p2277_p9)
}
  0x32   :  { %s2314_s3 = smov 64   ;;  %s2315_s12 = smov 4  }
  0x33   :  { %62 = dma.hbm_to_vmem [thread:$0]  %s2484_s7, 4096, %s57_s15, [#allocation7], %s2314_s3, %s2314_s3, %s2315_s12  }
  0x34   :  { %2303 = dma.done.wait [#allocation4], 2048  }
  0x35   :  { %2304 = vsyncadd [#allocation4], 4294965248 }
  0x36   :  { %2305 = dma.done.wait [#allocation7], 20480  }
  0x37   :  { %2306 = vsyncadd [#allocation7], 4294946816  ;;  %v2316_v0 = vmov 0.0   ;;  %vm2317_vm0 = vmmov 0   ;;  %v1965_v1 = vld [vmem:[%s2478_s1] sm:$0xff]   ;;  %v1966_v2 = vld [vmem:[%s2478_s1 + $0x8] sm:$0xff]  }
  0x38   :  { %1934 = vmatprep.subr.bf16.mxu0 %v2316_v0  ;;  %1938 = vmatprep.mubr.msk.bf16.mxu0 %vm2317_vm0, %v2316_v0  ;;  %v75_v3 = vld [vmem:[%s2477_s0] sm:$0xf]  ;;  %vm99_vm1 = vcmask 261120   ;;  %v1967_v4 = vld [vmem:[#allocation3 + $0x4] ss:$16 sps:$4 sm:$0xff]   ;;  %v2318_v20 = vmov 0  }
  0x39   :  { %1935 = vmatpush3.bf16.msra.mxu0 %v1965_v1  ;;  %v1971_v5 = vld [vmem:[#allocation3 + $0xc] ss:$16 sps:$4 sm:$0xff]   ;;  %v1969_v6 = vld [vmem:[#allocation3 + $0x8] ss:$16 sps:$4 sm:$0xff]   ;;  %v1972_v7 = vld [vmem:[#allocation3] ss:$16 sps:$4 sm:$0xff]   ;;  %292 = vmatprep.subr.bf16.mxu1 %v1967_v4 }
  0x3a   :  { %1936 = vmatprep.subr.bf16.mxu0 %v2316_v0  ;;  %293 = vmatpush1.bf16.msra.mxu1 %v1972_v7  ;;  %v1973_v8 = vld [vmem:[#allocation3 + $0x24] ss:$16 sps:$4 sm:$0xff]   ;;  %v1977_v9 = vld [vmem:[#allocation3 + $0x2c] ss:$16 sps:$4 sm:$0xff]   ;;  %v1975_v10 = vld [vmem:[#allocation3 + $0x28] ss:$16 sps:$4 sm:$0xff]  }
  0x3b   :  { %v1978_v11 = vld [vmem:[#allocation3 + $0x20] ss:$16 sps:$4 sm:$0xff]   ;;  %294 = vmatprep.subr.bf16.mxu1 %v1973_v8  ;;  %v1979_v12 = vld [vmem:[#allocation3 + $0x44] ss:$16 sps:$4 sm:$0xff]   ;;  %v1981_v13 = vld [vmem:[#allocation3 + $0x48] ss:$16 sps:$4 sm:$0xff]   ;;  %324 = vmatprep.mubr.bf16.mxu1 %v2318_v20 }
  0x3c   :  { %v1983_v14 = vld [vmem:[#allocation3 + $0x4c] ss:$16 sps:$4 sm:$0xff]   ;;  %v1984_v15 = vld [vmem:[#allocation3 + $0x40] ss:$16 sps:$4 sm:$0xff]   ;;  %v1985_v16 = vld [vmem:[#allocation3 + $0x64] ss:$16 sps:$4 sm:$0xff]  }
  0x3d   :  { %1937 = vmatpush3.bf16.msra.mxu0 %v1966_v2  ;;  %v1989_v17 = vld [vmem:[#allocation3 + $0x6c] ss:$16 sps:$4 sm:$0xff]   ;;  %v1987_v18 = vld [vmem:[#allocation3 + $0x68] ss:$16 sps:$4 sm:$0xff]   ;;  %v1990_v19 = vld [vmem:[#allocation3 + $0x60] ss:$16 sps:$4 sm:$0xff]  }
  0x3e   :  { %333 = vmatprep.subr.bf16.mxu0 %v1971_v5  ;;  %295 = vmatpush1.bf16.msra.mxu1 %v1978_v11  ;;  %v1993_v21 = vld [vmem:[#allocation6 + $0x4] ss:$16 sps:$4 sm:$0xff]   ;;  %v1996_v22 = vld [vmem:[#allocation6 + $0xc] ss:$16 sps:$4 sm:$0xff]   ;;  %vm144_vm2 = vcmask 519168   ;;  %vm154_vm3 = vcmask 516096  }
  0x3f   :  { %296 = vmatprep.subr.bf16.mxu1 %v1979_v12  ;;  %v1704_v23 = vld [vmem:[%s2479_s2] ss:$0 sm:$0xff]  ;;  %vm288_vm4 = vcmask 523264   ;;  %v1991_v48 = vld [vmem:[#allocation6] ss:$16 sps:$4 sm:$0xff]   ;;  %s2319_s10 = smov [#allocation9]  }
  0x40   :  { %1939 = vmatmul.mubr.msk.bf16.vlgmr.msra.gmra.mrb[0].mxu0 %vm99_vm1, %v75_v3  ;;  %v1994_v49 = vld [vmem:[#allocation6 + $0x8] ss:$16 sps:$4 sm:$0xff]   ;;  %v1999_v51 = vld [vmem:[#allocation6 + $0x24] ss:$16 sps:$4 sm:$0xff]   ;;  %v2002_v52 = vld [vmem:[#allocation6 + $0x2c] ss:$16 sps:$4 sm:$0xff]  }
  0x41   :  { %334 = vmatpush1.bf16.msra.mxu0 %v1969_v6  ;;  %365 = vmatprep.mubr.bf16.mxu0 %v2318_v20  ;;  %v1997_v53 = vld [vmem:[#allocation6 + $0x20] ss:$16 sps:$4 sm:$0xff]   ;;  %v2000_v54 = vld [vmem:[#allocation6 + $0x28] ss:$16 sps:$4 sm:$0xff]   ;;  %v2005_v55 = vld [vmem:[#allocation6 + $0x44] ss:$16 sps:$4 sm:$0xff]  }
  0x42   :  { %335 = vmatprep.subr.bf16.mxu0 %v1977_v9  ;;  %297 = vmatpush1.bf16.msra.mxu1 %v1984_v15  ;;  %v2008_v56 = vld [vmem:[#allocation6 + $0x4c] ss:$16 sps:$4 sm:$0xff]   ;;  %v2003_v57 = vld [vmem:[#allocation6 + $0x40] ss:$16 sps:$4 sm:$0xff]   ;;  %v2006_v58 = vld [vmem:[#allocation6 + $0x48] ss:$16 sps:$4 sm:$0xff]  }
  0x43   :  { %298 = vmatprep.subr.bf16.mxu1 %v1985_v16  ;;  %v2011_v59 = vld [vmem:[#allocation6 + $0x64] ss:$16 sps:$4 sm:$0xff]   ;;  %v2014_v60 = vld [vmem:[#allocation6 + $0x6c] ss:$16 sps:$4 sm:$0xff]   ;;  %v2009_v61 = vld [vmem:[#allocation6 + $0x60] ss:$16 sps:$4 sm:$0xff]  }
  0x44   :  { %v2012_v62 = vld [vmem:[#allocation6 + $0x68] ss:$16 sps:$4 sm:$0xff]   ;;  %v2017_v63 = vld [vmem:[#allocation6 + $0x84] ss:$16 sps:$4 sm:$0xff]   ;;  %v2020_v0 = vld [vmem:[#allocation6 + $0x8c] ss:$16 sps:$4 sm:$0xff]  }
  0x45   :  { %336 = vmatpush1.bf16.msra.mxu0 %v1975_v10  ;;  %v2015_v1 = vld [vmem:[#allocation6 + $0x80] ss:$16 sps:$4 sm:$0xff]   ;;  %v2018_v2 = vld [vmem:[#allocation6 + $0x88] ss:$16 sps:$4 sm:$0xff]   ;;  %v2023_v3 = vld [vmem:[#allocation6 + $0xa4] ss:$16 sps:$4 sm:$0xff]  }
  0x46   :  { %337 = vmatprep.subr.bf16.mxu0 %v1983_v14  ;;  %299 = vmatpush1.bf16.msra.mxu1 %v1990_v19  ;;  %v2026_v4 = vld [vmem:[#allocation6 + $0xac] ss:$16 sps:$4 sm:$0xff]   ;;  %v2021_v5 = vld [vmem:[#allocation6 + $0xa0] ss:$16 sps:$4 sm:$0xff]   ;;  %v2024_v6 = vld [vmem:[#allocation6 + $0xa8] ss:$16 sps:$4 sm:$0xff]  }
  0x47   :  { %1172 = vmatprep.subr.bf16.mxu1 %v1993_v21  ;;  %v2029_v7 = vld [vmem:[#allocation6 + $0xc4] ss:$16 sps:$4 sm:$0xff]   ;;  %v2032_v8 = vld [vmem:[#allocation6 + $0xcc] ss:$16 sps:$4 sm:$0xff]   ;;  %v2027_v9 = vld [vmem:[#allocation6 + $0xc0] ss:$16 sps:$4 sm:$0xff]  }
  0x48   :  { %v2030_v10 = vld [vmem:[#allocation6 + $0xc8] ss:$16 sps:$4 sm:$0xff]   ;;  %v2035_v11 = vld [vmem:[#allocation6 + $0xe4] ss:$16 sps:$4 sm:$0xff]   ;;  %v2038_v12 = vld [vmem:[#allocation6 + $0xec] ss:$16 sps:$4 sm:$0xff]  }
  0x49   :  { %338 = vmatpush1.bf16.msra.mxu0 %v1981_v13  ;;  %v2033_v13 = vld [vmem:[#allocation6 + $0xe0] ss:$16 sps:$4 sm:$0xff]   ;;  %v2036_v14 = vld [vmem:[#allocation6 + $0xe8] ss:$16 sps:$4 sm:$0xff]   ;;  %v2041_v15 = vld [vmem:[#allocation6 + $0x104] ss:$16 sps:$4 sm:$0xff]  }
  0x4a   :  { %339 = vmatprep.subr.bf16.mxu0 %v1989_v17  ;;  %v2044_v16 = vld [vmem:[#allocation6 + $0x10c] ss:$16 sps:$4 sm:$0xff]   ;;  %v2039_v17 = vld [vmem:[#allocation6 + $0x100] ss:$16 sps:$4 sm:$0xff]   ;;  %v2047_v19 = vld [vmem:[#allocation6 + $0x124] ss:$16 sps:$4 sm:$0xff]  }
  0x4b   :  { %v2050_v20 = vld [vmem:[#allocation6 + $0x12c] ss:$16 sps:$4 sm:$0xff]   ;;  %v2045_v21 = vld [vmem:[#allocation6 + $0x120] ss:$16 sps:$4 sm:$0xff]   ;;  %s1694_s14 = sshll.u32 %s2319_s10, 4  ;;  %s1695_s14 = int_to_ptr.vmem [resolvable:$true] %s1694_s14 }
  0x4c   :  { %s2281_s15 = scalar_lea.vmem %s1695_s14, 32  ;;  %p2286_p11 = scmp.lt.s32.totalorder %s1695_s14, %s1695_s14 }
  0x4d   :  { %340 = vmatpush1.bf16.msra.mxu0 %v1987_v18  ;;  %v2042_v18 = vld [vmem:[#allocation6 + $0x108] ss:$16 sps:$4 sm:$0xff]   ;;  %p2282_p10 = scmp.ne.s32.totalorder %s1695_s14, %s2281_s15  ;;  %p2287_p12 = scmp.lt.s32.totalorder %s2281_s15, %s2281_s15 }
  0x4e   :  { %1254 = vmatprep.subr.bf16.mxu0 %v1996_v22  ;;  %v2048_v22 = vld [vmem:[#allocation6 + $0x128] ss:$16 sps:$4 sm:$0xff]  }
  0x4f   :  { %p2288_p13 = por %p2287_p12, %p2286_p11 }
  0x51   :  { %p2289_p0 = pnand %p2288_p13, %p2282_p10 }
 0x113   :  { %v137_v24 = vpop.f32.mrb[0].mxu0 }
 0x114   :  { %v138_v25 = vadd.f32 %v1704_v23, %v137_v24  ;;  %v1940_v26 = vpop.f32.mrb[1].mxu0  ;;  %v2053_v23 = vld [vmem:[#allocation6 + $0x144] ss:$16 sps:$4 sm:$0xff]   ;;  %v2056_v24 = vld [vmem:[#allocation6 + $0x14c] ss:$16 sps:$4 sm:$0xff]  }
 0x115   :  { %v140_v27 = vpop.f32.mrb[2].mxu0  ;;  %v2054_v26 = vld [vmem:[#allocation6 + $0x148] ss:$16 sps:$4 sm:$0xff]  }
 0x116   :  { %v143_v28 = vmax.f32 %v138_v25, 0.0  ;;  %v1941_v29 = vpop.f32.mrb[3].mxu0  ;;  %v2051_v25 = vld [vmem:[#allocation6 + $0x140] ss:$16 sps:$4 sm:$0xff]   ;;  %v2059_v27 = vld [vmem:[#allocation6 + $0x164] ss:$16 sps:$4 sm:$0xff]  }
 0x117   :  { %v2057_v29 = vld [vmem:[#allocation6 + $0x160] ss:$16 sps:$4 sm:$0xff]  }
 0x118   :  { %v145_v30 = vsel %vm144_vm2, %v143_v28, 0.0  ;;  %v157_v31 = vrot.slane %v143_v28, 4  ;;  %v2062_v28 = vld [vmem:[#allocation6 + $0x16c] ss:$16 sps:$4 sm:$0xff]  }
 0x119   :  { %v146_v32 = vrot.slane %v145_v30, 4 }
 0x11a   :  { %v159_v33 = vsel %vm144_vm2, %v157_v31, 0.0  ;;  %v2065_v31 = vld [vmem:[#allocation6 + $0x184] ss:$16 sps:$4 sm:$0xff]  }
 0x11b   :  { %v147_v34 = vadd.f32 %v146_v32, %v145_v30  ;;  %v160_v35 = vrot.slane %v159_v33, 4  ;;  %v2060_v30 = vld [vmem:[#allocation6 + $0x168] ss:$16 sps:$4 sm:$0xff]   ;;  %v2068_v32 = vld [vmem:[#allocation6 + $0x18c] ss:$16 sps:$4 sm:$0xff]  }
 0x11d   :  { %v148_v36 = vrot.slane %v147_v34, 2  ;;  %v161_v37 = vadd.f32 %v160_v35, %v159_v33  ;;  %v2063_v33 = vld [vmem:[#allocation6 + $0x180] ss:$16 sps:$4 sm:$0xff]   ;;  %v2071_v35 = vld [vmem:[#allocation6 + $0x1a4] ss:$16 sps:$4 sm:$0xff]  }
 0x11f   :  { %v149_v38 = vadd.f32 %v148_v36, %v147_v34  ;;  %v162_v39 = vrot.slane %v161_v37, 2  ;;  %v2066_v34 = vld [vmem:[#allocation6 + $0x188] ss:$16 sps:$4 sm:$0xff]   ;;  %v2074_v36 = vld [vmem:[#allocation6 + $0x1ac] ss:$16 sps:$4 sm:$0xff]  }
 0x121   :  { %v150_v40 = vrot.slane %v149_v38, 1  ;;  %v163_v41 = vadd.f32 %v162_v39, %v161_v37  ;;  %v2069_v37 = vld [vmem:[#allocation6 + $0x1a0] ss:$16 sps:$4 sm:$0xff]   ;;  %v2077_v39 = vld [vmem:[#allocation6 + $0x1c4] ss:$16 sps:$4 sm:$0xff]  }
 0x123   :  { %v151_v42 = vadd.f32 %v150_v40, %v149_v38  ;;  %v164_v43 = vrot.slane %v163_v41, 1  ;;  %v2072_v38 = vld [vmem:[#allocation6 + $0x1a8] ss:$16 sps:$4 sm:$0xff]   ;;  %v2080_v40 = vld [vmem:[#allocation6 + $0x1cc] ss:$16 sps:$4 sm:$0xff]  }
 0x125   :  { %v153_v44 = vmul.f32 0.25, %v151_v42  ;;  %v165_v45 = vadd.f32 %v164_v43, %v163_v41  ;;  %v2075_v41 = vld [vmem:[#allocation6 + $0x1c0] ss:$16 sps:$4 sm:$0xff]   ;;  %v2078_v42 = vld [vmem:[#allocation6 + $0x1c8] ss:$16 sps:$4 sm:$0xff]  }
 0x126   :  { %v2083_v43 = vld [vmem:[#allocation6 + $0x1e4] ss:$16 sps:$4 sm:$0xff]  }
 0x127   :  { %155 = vst.msk [vmem:[#allocation2] sm:$0x1] %vm154_vm3, %v153_v44  ;;  %v166_v46 = vmul.f32 0.25, %v165_v45  ;;  %v2086_v44 = vld [vmem:[#allocation6 + $0x1ec] ss:$16 sps:$4 sm:$0xff]  }
 0x128   :  { %v2081_v45 = vld [vmem:[#allocation6 + $0x1e0] ss:$16 sps:$4 sm:$0xff]  }
 0x129   :  { %167 = vst.msk [vmem:[#allocation2 + $0x1] sm:$0x1] %vm154_vm3, %v166_v46  ;;  %v2084_v46 = vld [vmem:[#allocation6 + $0x1e8] ss:$16 sps:$4 sm:$0xff]  }
 0x130   :  { %v168_v47 = vld [vmem:[#allocation2] sm:$0x3] }
 0x131   :  { %v169_v50 = vpack.c.bf16 %v168_v47, %v168_v47  ;;  %v2089_v47 = vld [vmem:[#allocation6 + $0x204] ss:$16 sps:$4 sm:$0xff]  }
 0x133   :  { %1724 = vmatmul.mubr.msk.bf16.vlgmr.msra.gmra.mrb[0].mxu1 %vm288_vm4, %v169_v50  ;;  %1725 = vmatmul.mubr.msk.bf16.vlgmr.msra.gmra.mrb[4].mxu0 %vm288_vm4, %v169_v50 }
 0x134   :  { %1173 = vmatpush1.bf16.msra.mxu1 %v1991_v48  ;;  %1255 = vmatpush1.bf16.msra.mxu0 %v1994_v49  ;;  %v2092_v48 = vld [vmem:[#allocation6 + $0x20c] ss:$16 sps:$4 sm:$0xff]   ;;  %v188_v49 = vlaneseq }
 0x135   :  { %1174 = vmatprep.subr.bf16.mxu1 %v1999_v51  ;;  %1256 = vmatprep.subr.bf16.mxu0 %v2002_v52  ;;  %v2431_v52 = vld [vmem:[%s2481_s4] sm:$0xf] }
 0x136   :  { %v2425_v50 = vshrl.u32 %v188_v49, 7  ;;  %v2149_v49 = vld [vmem:[#allocation6 + $0x344] ss:$16 sps:$4 sm:$0xff]  }
 0x138   :  { %1175 = vmatpush1.bf16.msra.mxu1 %v1997_v53  ;;  %1257 = vmatpush1.bf16.msra.mxu0 %v2000_v54  ;;  %v190_v51 = vsub.s32 0, %v2425_v50  ;;  %v194_v53 = vsub.s32 1, %v2425_v50  ;;  %v202_v54 = vsub.s32 3, %v2425_v50 }
 0x139   :  { %1176 = vmatprep.subr.bf16.mxu1 %v2005_v55  ;;  %1258 = vmatprep.subr.bf16.mxu0 %v2008_v56 }
 0x13a   :  { %v191_v55 = vrot.slane %v2431_v52, %v190_v51  ;;  %v195_v56 = vrot.slane %v2431_v52, %v194_v53 }
 0x13c   :  { %1177 = vmatpush1.bf16.msra.mxu1 %v2003_v57  ;;  %1259 = vmatpush1.bf16.msra.mxu0 %v2006_v58  ;;  %v203_v57 = vrot.slane %v2431_v52, %v202_v54 }
 0x13d   :  { %1178 = vmatprep.subr.bf16.mxu1 %v2011_v59  ;;  %1260 = vmatprep.subr.bf16.mxu0 %v2014_v60 }
 0x140   :  { %1179 = vmatpush1.bf16.msra.mxu1 %v2009_v61  ;;  %1261 = vmatpush1.bf16.msra.mxu0 %v2012_v62 }
 0x141   :  { %1180 = vmatprep.subr.bf16.mxu1 %v2017_v63  ;;  %1262 = vmatprep.subr.bf16.mxu0 %v2020_v0 }
 0x144   :  { %1181 = vmatpush1.bf16.msra.mxu1 %v2015_v1  ;;  %1263 = vmatpush1.bf16.msra.mxu0 %v2018_v2 }
 0x145   :  { %1182 = vmatprep.subr.bf16.mxu1 %v2023_v3  ;;  %1264 = vmatprep.subr.bf16.mxu0 %v2026_v4 }
 0x148   :  { %1183 = vmatpush1.bf16.msra.mxu1 %v2021_v5  ;;  %1265 = vmatpush1.bf16.msra.mxu0 %v2024_v6 }
 0x149   :  { %1184 = vmatprep.subr.bf16.mxu1 %v2029_v7  ;;  %1266 = vmatprep.subr.bf16.mxu0 %v2032_v8 }
 0x14c   :  { %1185 = vmatpush1.bf16.msra.mxu1 %v2027_v9  ;;  %1267 = vmatpush1.bf16.msra.mxu0 %v2030_v10  ;;  %v2087_v9 = vld [vmem:[#allocation6 + $0x200] ss:$16 sps:$4 sm:$0xff]   ;;  %v2090_v10 = vld [vmem:[#allocation6 + $0x208] ss:$16 sps:$4 sm:$0xff]  }
 0x14d   :  { %1186 = vmatprep.subr.bf16.mxu1 %v2035_v11  ;;  %1268 = vmatprep.subr.bf16.mxu0 %v2038_v12  ;;  %v2095_v12 = vld [vmem:[#allocation6 + $0x224] ss:$16 sps:$4 sm:$0xff]  }
 0x150   :  { %1187 = vmatpush1.bf16.msra.mxu1 %v2033_v13  ;;  %1269 = vmatpush1.bf16.msra.mxu0 %v2036_v14  ;;  %v2098_v13 = vld [vmem:[#allocation6 + $0x22c] ss:$16 sps:$4 sm:$0xff]  }
 0x151   :  { %1188 = vmatprep.subr.bf16.mxu1 %v2041_v15  ;;  %1270 = vmatprep.subr.bf16.mxu0 %v2044_v16  ;;  %v2093_v15 = vld [vmem:[#allocation6 + $0x220] ss:$16 sps:$4 sm:$0xff]   ;;  %v2096_v16 = vld [vmem:[#allocation6 + $0x228] ss:$16 sps:$4 sm:$0xff]  }
 0x154   :  { %1189 = vmatpush1.bf16.msra.mxu1 %v2039_v17  ;;  %1271 = vmatpush1.bf16.msra.mxu0 %v2042_v18  ;;  %v2101_v17 = vld [vmem:[#allocation6 + $0x244] ss:$16 sps:$4 sm:$0xff]   ;;  %v2104_v18 = vld [vmem:[#allocation6 + $0x24c] ss:$16 sps:$4 sm:$0xff]  }
 0x155   :  { %1190 = vmatprep.subr.bf16.mxu1 %v2047_v19  ;;  %1272 = vmatprep.subr.bf16.mxu0 %v2050_v20  ;;  %v2099_v19 = vld [vmem:[#allocation6 + $0x240] ss:$16 sps:$4 sm:$0xff]   ;;  %v2102_v20 = vld [vmem:[#allocation6 + $0x248] ss:$16 sps:$4 sm:$0xff]  }
 0x158   :  { %1191 = vmatpush1.bf16.msra.mxu1 %v2045_v21  ;;  %1273 = vmatpush1.bf16.msra.mxu0 %v2048_v22  ;;  %v2107_v21 = vld [vmem:[#allocation6 + $0x264] ss:$16 sps:$4 sm:$0xff]   ;;  %v2110_v22 = vld [vmem:[#allocation6 + $0x26c] ss:$16 sps:$4 sm:$0xff]  }
 0x159   :  { %1192 = vmatprep.subr.bf16.mxu1 %v2053_v23  ;;  %1274 = vmatprep.subr.bf16.mxu0 %v2056_v24  ;;  %v2105_v23 = vld [vmem:[#allocation6 + $0x260] ss:$16 sps:$4 sm:$0xff]   ;;  %v2108_v24 = vld [vmem:[#allocation6 + $0x268] ss:$16 sps:$4 sm:$0xff]  }
 0x15c   :  { %1193 = vmatpush1.bf16.msra.mxu1 %v2051_v25  ;;  %1275 = vmatpush1.bf16.msra.mxu0 %v2054_v26  ;;  %v2113_v25 = vld [vmem:[#allocation6 + $0x284] ss:$16 sps:$4 sm:$0xff]   ;;  %v2116_v26 = vld [vmem:[#allocation6 + $0x28c] ss:$16 sps:$4 sm:$0xff]  }
 0x15d   :  { %1194 = vmatprep.subr.bf16.mxu1 %v2059_v27  ;;  %1276 = vmatprep.subr.bf16.mxu0 %v2062_v28  ;;  %v2111_v27 = vld [vmem:[#allocation6 + $0x280] ss:$16 sps:$4 sm:$0xff]   ;;  %v2114_v28 = vld [vmem:[#allocation6 + $0x288] ss:$16 sps:$4 sm:$0xff]  }
 0x160   :  { %1195 = vmatpush1.bf16.msra.mxu1 %v2057_v29  ;;  %1277 = vmatpush1.bf16.msra.mxu0 %v2060_v30  ;;  %v2119_v29 = vld [vmem:[#allocation6 + $0x2a4] ss:$16 sps:$4 sm:$0xff]   ;;  %v2122_v30 = vld [vmem:[#allocation6 + $0x2ac] ss:$16 sps:$4 sm:$0xff]  }
 0x161   :  { %1196 = vmatprep.subr.bf16.mxu1 %v2065_v31  ;;  %1278 = vmatprep.subr.bf16.mxu0 %v2068_v32  ;;  %v2117_v31 = vld [vmem:[#allocation6 + $0x2a0] ss:$16 sps:$4 sm:$0xff]   ;;  %v2120_v32 = vld [vmem:[#allocation6 + $0x2a8] ss:$16 sps:$4 sm:$0xff]  }
 0x164   :  { %1197 = vmatpush1.bf16.msra.mxu1 %v2063_v33  ;;  %1279 = vmatpush1.bf16.msra.mxu0 %v2066_v34  ;;  %v2125_v33 = vld [vmem:[#allocation6 + $0x2c4] ss:$16 sps:$4 sm:$0xff]   ;;  %v2128_v34 = vld [vmem:[#allocation6 + $0x2cc] ss:$16 sps:$4 sm:$0xff]  }
 0x165   :  { %1198 = vmatprep.subr.bf16.mxu1 %v2071_v35  ;;  %1280 = vmatprep.subr.bf16.mxu0 %v2074_v36  ;;  %v2123_v35 = vld [vmem:[#allocation6 + $0x2c0] ss:$16 sps:$4 sm:$0xff]   ;;  %v2126_v36 = vld [vmem:[#allocation6 + $0x2c8] ss:$16 sps:$4 sm:$0xff]  }
 0x168   :  { %1199 = vmatpush1.bf16.msra.mxu1 %v2069_v37  ;;  %1281 = vmatpush1.bf16.msra.mxu0 %v2072_v38  ;;  %v2131_v37 = vld [vmem:[#allocation6 + $0x2e4] ss:$16 sps:$4 sm:$0xff]   ;;  %v2134_v38 = vld [vmem:[#allocation6 + $0x2ec] ss:$16 sps:$4 sm:$0xff]  }
 0x169   :  { %1200 = vmatprep.subr.bf16.mxu1 %v2077_v39  ;;  %1282 = vmatprep.subr.bf16.mxu0 %v2080_v40  ;;  %v2129_v39 = vld [vmem:[#allocation6 + $0x2e0] ss:$16 sps:$4 sm:$0xff]   ;;  %v2132_v40 = vld [vmem:[#allocation6 + $0x2e8] ss:$16 sps:$4 sm:$0xff]  }
 0x16c   :  { %1201 = vmatpush1.bf16.msra.mxu1 %v2075_v41  ;;  %1283 = vmatpush1.bf16.msra.mxu0 %v2078_v42  ;;  %v2137_v41 = vld [vmem:[#allocation6 + $0x304] ss:$16 sps:$4 sm:$0xff]   ;;  %v2140_v42 = vld [vmem:[#allocation6 + $0x30c] ss:$16 sps:$4 sm:$0xff]  }
 0x16d   :  { %1202 = vmatprep.subr.bf16.mxu1 %v2083_v43  ;;  %1284 = vmatprep.subr.bf16.mxu0 %v2086_v44  ;;  %v2135_v43 = vld [vmem:[#allocation6 + $0x300] ss:$16 sps:$4 sm:$0xff]   ;;  %v2138_v44 = vld [vmem:[#allocation6 + $0x308] ss:$16 sps:$4 sm:$0xff]  }
 0x170   :  { %1203 = vmatpush1.bf16.msra.mxu1 %v2081_v45  ;;  %1285 = vmatpush1.bf16.msra.mxu0 %v2084_v46  ;;  %v2143_v45 = vld [vmem:[#allocation6 + $0x324] ss:$16 sps:$4 sm:$0xff]   ;;  %v2146_v46 = vld [vmem:[#allocation6 + $0x32c] ss:$16 sps:$4 sm:$0xff]  }
 0x171   :  { %1213 = vmatprep.subr.bf16.mxu1 %v2089_v47  ;;  %1295 = vmatprep.subr.bf16.mxu0 %v2092_v48  ;;  %v2141_v47 = vld [vmem:[#allocation6 + $0x320] ss:$16 sps:$4 sm:$0xff]   ;;  %v2144_v48 = vld [vmem:[#allocation6 + $0x328] ss:$16 sps:$4 sm:$0xff]  }
 0x206   :  { %v326_v58 = vpop.f32.mrb[0].mxu1  ;;  %v2444_v59 = vpop.f32.mrb[4].mxu0 }
 0x207   :  { %v327_v60 = vadd.f32 %v326_v58, %v191_v55  ;;  %v328_v61 = vpop.f32.mrb[1].mxu1  ;;  %v369_v62 = vpop.f32.mrb[5].mxu0  ;;  %v2152_v55 = vld [vmem:[#allocation6 + $0x34c] ss:$16 sps:$4 sm:$0xff]   ;;  %v2155_v58 = vld [vmem:[#allocation6 + $0x364] ss:$16 sps:$4 sm:$0xff]  }
 0x208   :  { %v329_v63 = vadd.f32 %v328_v61, %v195_v56  ;;  %v370_v0 = vadd.f32 %v369_v62, %v203_v57  ;;  %v330_v1 = vpop.f32.mrb[2].mxu1  ;;  %v371_v2 = vpop.f32.mrb[6].mxu0  ;;  %v2147_v56 = vld [vmem:[#allocation6 + $0x340] ss:$16 sps:$4 sm:$0xff]   ;;  %v2150_v57 = vld [vmem:[#allocation6 + $0x348] ss:$16 sps:$4 sm:$0xff]  }
 0x209   :  { %v374_v3 = vmax.f32 %v327_v60, 0.0  ;;  %v331_v4 = vpop.f32.mrb[3].mxu1  ;;  %v372_v5 = vpop.f32.mrb[7].mxu0  ;;  %v2158_v60 = vld [vmem:[#allocation6 + $0x36c] ss:$16 sps:$4 sm:$0xff]  }
 0x20a   :  { %v375_v6 = vmax.f32 %v329_v63, 0.0  ;;  %v377_v7 = vmax.f32 %v370_v0, 0.0  ;;  %v2153_v61 = vld [vmem:[#allocation6 + $0x360] ss:$16 sps:$4 sm:$0xff]   ;;  %v2156_v62 = vld [vmem:[#allocation6 + $0x368] ss:$16 sps:$4 sm:$0xff]  }
 0x20b   :  { %v378_v11 = vpack.c.bf16 %v374_v3, %v374_v3  ;;  %v2161_v63 = vld [vmem:[#allocation6 + $0x384] ss:$16 sps:$4 sm:$0xff]   ;;  %v2164_v0 = vld [vmem:[#allocation6 + $0x38c] ss:$16 sps:$4 sm:$0xff]   ;;  %v2159_v1 = vld [vmem:[#allocation6 + $0x380] ss:$16 sps:$4 sm:$0xff]  }
 0x20c   :  { %v379_v8 = vpack.c.bf16 %v375_v6, %v375_v6  ;;  %v381_v14 = vpack.c.bf16 %v377_v7, %v377_v7  ;;  %v2162_v2 = vld [vmem:[#allocation6 + $0x388] ss:$16 sps:$4 sm:$0xff]   ;;  %v198_v3 = vsub.s32 2, %v2425_v50  ;;  %v2167_v4 = vld [vmem:[#allocation6 + $0x3a4] ss:$16 sps:$4 sm:$0xff]  }
 0x20d   :  { %v2170_v5 = vld [vmem:[#allocation6 + $0x3ac] ss:$16 sps:$4 sm:$0xff]   ;;  %v2165_v6 = vld [vmem:[#allocation6 + $0x3a0] ss:$16 sps:$4 sm:$0xff]   ;;  %v2168_v7 = vld [vmem:[#allocation6 + $0x3a8] ss:$16 sps:$4 sm:$0xff]  }
 0x20e   :  { %1204 = vmatprep.mubr.bf16.mxu1 %v379_v8  ;;  %1286 = vmatprep.mubr.bf16.mxu0 %v379_v8  ;;  %v199_v8 = vrot.slane %v2431_v52, %v198_v3  ;;  %v2183_v52 = vld [vmem:[#allocation8 + $0x40] sm:$0xff]  }
 0x20f   :  { %1205 = vmatmul.mubr.bf16.vlgmr.msra.gmra.mrb[4].mxu1 %v378_v11  ;;  %1287 = vmatmul.mubr.bf16.vlgmr.msra.gmra.mrb[8].mxu0 %v378_v11  ;;  %v2171_v11 = vld [vmem:[#allocation6 + $0x3c0] ss:$16 sps:$4 sm:$0xff]  }
 0x210   :  { %1214 = vmatpush1.bf16.msra.mxu1 %v2087_v9  ;;  %1296 = vmatpush1.bf16.msra.mxu0 %v2090_v10  ;;  %v2173_v9 = vld [vmem:[#allocation6 + $0x3c4] ss:$16 sps:$4 sm:$0xff]   ;;  %v2176_v10 = vld [vmem:[#allocation6 + $0x3cc] ss:$16 sps:$4 sm:$0xff]  }
 0x211   :  { %1245 = vmatprep.mubr.bf16.mxu1 %v381_v14  ;;  %1327 = vmatprep.mubr.bf16.mxu0 %v381_v14  ;;  %v2179_v14 = vld [vmem:[#allocation6 + $0x3e4] ss:$16 sps:$4 sm:$0xff]  }
 0x212   :  { %1215 = vmatprep.subr.bf16.mxu1 %v2095_v12  ;;  %1297 = vmatprep.subr.bf16.mxu0 %v2098_v13  ;;  %v2174_v12 = vld [vmem:[#allocation6 + $0x3c8] ss:$16 sps:$4 sm:$0xff]   ;;  %v368_v13 = vadd.f32 %v2444_v59, %v199_v8 }
 0x213   :  { %v2187_v59 = vld [vmem:[#allocation8 + $0x48] sm:$0xff]  }
 0x214   :  { %1216 = vmatpush1.bf16.msra.mxu1 %v2093_v15  ;;  %1298 = vmatpush1.bf16.msra.mxu0 %v2096_v16  ;;  %v2182_v15 = vld [vmem:[#allocation6 + $0x3ec] ss:$16 sps:$4 sm:$0xff]   ;;  %v2177_v16 = vld [vmem:[#allocation6 + $0x3e0] ss:$16 sps:$4 sm:$0xff]  }
 0x215   :  { %1217 = vmatprep.subr.bf16.mxu1 %v2101_v17  ;;  %1299 = vmatprep.subr.bf16.mxu0 %v2104_v18  ;;  %v2180_v17 = vld [vmem:[#allocation6 + $0x3e8] ss:$16 sps:$4 sm:$0xff]   ;;  %v376_v18 = vmax.f32 %v368_v13, 0.0 }
 0x218   :  { %1218 = vmatpush1.bf16.msra.mxu1 %v2099_v19  ;;  %1300 = vmatpush1.bf16.msra.mxu0 %v2102_v20  ;;  %v2184_v19 = vld [vmem:[#allocation8 + $0xc0] sm:$0xff]  }
 0x219   :  { %1219 = vmatprep.subr.bf16.mxu1 %v2107_v21  ;;  %1301 = vmatprep.subr.bf16.mxu0 %v2110_v22  ;;  %v2185_v20 = vld [vmem:[#allocation8] sm:$0xff]   ;;  %v380_v22 = vpack.c.bf16 %v376_v18, %v376_v18 }
 0x21a   :  { %v2186_v21 = vld [vmem:[#allocation8 + $0x80] sm:$0xff]  }
 0x21c   :  { %1220 = vmatpush1.bf16.msra.mxu1 %v2105_v23  ;;  %1302 = vmatpush1.bf16.msra.mxu0 %v2108_v24  ;;  %v2188_v23 = vld [vmem:[#allocation8 + $0xc8] sm:$0xff]  }
 0x21d   :  { %1221 = vmatprep.subr.bf16.mxu1 %v2113_v25  ;;  %1303 = vmatprep.subr.bf16.mxu0 %v2116_v26  ;;  %v2189_v24 = vld [vmem:[#allocation8 + $0x8] sm:$0xff]   ;;  %v2191_v26 = vld [vmem:[#allocation8 + $0x50] sm:$0xff]  }
 0x21e   :  { %v2190_v25 = vld [vmem:[#allocation8 + $0x88] sm:$0xff]  }
 0x220   :  { %1222 = vmatpush1.bf16.msra.mxu1 %v2111_v27  ;;  %1304 = vmatpush1.bf16.msra.mxu0 %v2114_v28  ;;  %v2192_v27 = vld [vmem:[#allocation8 + $0xd0] sm:$0xff]  }
 0x221   :  { %1223 = vmatprep.subr.bf16.mxu1 %v2119_v29  ;;  %1305 = vmatprep.subr.bf16.mxu0 %v2122_v30  ;;  %v2193_v28 = vld [vmem:[#allocation8 + $0x10] sm:$0xff]   ;;  %v2195_v30 = vld [vmem:[#allocation8 + $0x58] sm:$0xff]  }
 0x222   :  { %v2194_v29 = vld [vmem:[#allocation8 + $0x90] sm:$0xff]  }
 0x224   :  { %1224 = vmatpush1.bf16.msra.mxu1 %v2117_v31  ;;  %1306 = vmatpush1.bf16.msra.mxu0 %v2120_v32  ;;  %v2196_v31 = vld [vmem:[#allocation8 + $0xd8] sm:$0xff]  }
 0x225   :  { %1225 = vmatprep.subr.bf16.mxu1 %v2125_v33  ;;  %1307 = vmatprep.subr.bf16.mxu0 %v2128_v34  ;;  %v2197_v32 = vld [vmem:[#allocation8 + $0x18] sm:$0xff]   ;;  %v2199_v34 = vld [vmem:[#allocation8 + $0x60] sm:$0xff]  }
 0x226   :  { %v2198_v33 = vld [vmem:[#allocation8 + $0x98] sm:$0xff]  }
 0x228   :  { %1226 = vmatpush1.bf16.msra.mxu1 %v2123_v35  ;;  %1308 = vmatpush1.bf16.msra.mxu0 %v2126_v36  ;;  %v2200_v35 = vld [vmem:[#allocation8 + $0xe0] sm:$0xff]  }
 0x229   :  { %1227 = vmatprep.subr.bf16.mxu1 %v2131_v37  ;;  %1309 = vmatprep.subr.bf16.mxu0 %v2134_v38  ;;  %v2201_v36 = vld [vmem:[#allocation8 + $0x20] sm:$0xff]   ;;  %v2203_v38 = vld [vmem:[#allocation8 + $0x68] sm:$0xff]  }
 0x22a   :  { %v2202_v37 = vld [vmem:[#allocation8 + $0xa0] sm:$0xff]  }
 0x22c   :  { %1228 = vmatpush1.bf16.msra.mxu1 %v2129_v39  ;;  %1310 = vmatpush1.bf16.msra.mxu0 %v2132_v40  ;;  %v2204_v39 = vld [vmem:[#allocation8 + $0xe8] sm:$0xff]  }
 0x22d   :  { %1229 = vmatprep.subr.bf16.mxu1 %v2137_v41  ;;  %1311 = vmatprep.subr.bf16.mxu0 %v2140_v42  ;;  %v2205_v40 = vld [vmem:[#allocation8 + $0x28] sm:$0xff]   ;;  %v2207_v42 = vld [vmem:[#allocation8 + $0x70] sm:$0xff]  }
 0x22e   :  { %v2206_v41 = vld [vmem:[#allocation8 + $0xa8] sm:$0xff]  }
 0x230   :  { %1230 = vmatpush1.bf16.msra.mxu1 %v2135_v43  ;;  %1312 = vmatpush1.bf16.msra.mxu0 %v2138_v44  ;;  %v2208_v43 = vld [vmem:[#allocation8 + $0xf0] sm:$0xff]  }
 0x231   :  { %1231 = vmatprep.subr.bf16.mxu1 %v2143_v45  ;;  %1313 = vmatprep.subr.bf16.mxu0 %v2146_v46  ;;  %v2209_v44 = vld [vmem:[#allocation8 + $0x30] sm:$0xff]   ;;  %v2211_v46 = vld [vmem:[#allocation8 + $0x78] sm:$0xff]  }
 0x232   :  { %v2210_v45 = vld [vmem:[#allocation8 + $0xb0] sm:$0xff]  }
 0x234   :  { %1232 = vmatpush1.bf16.msra.mxu1 %v2141_v47  ;;  %1314 = vmatpush1.bf16.msra.mxu0 %v2144_v48  ;;  %v2212_v47 = vld [vmem:[#allocation8 + $0xf8] sm:$0xff]  }
 0x235   :  { %1233 = vmatprep.subr.bf16.mxu1 %v2149_v49  ;;  %1315 = vmatprep.subr.bf16.mxu0 %v2152_v55  ;;  %v2213_v48 = vld [vmem:[#allocation8 + $0x38] sm:$0xff]   ;;  %v510_v55 = vld [vmem:[%s2483_s6] sm:$0xf] }
 0x236   :  { %v2214_v49 = vld [vmem:[#allocation8 + $0xb8] sm:$0xff]  }
 0x238   :  { %1234 = vmatpush1.bf16.msra.mxu1 %v2147_v56  ;;  %1316 = vmatpush1.bf16.msra.mxu0 %v2150_v57  ;;  %v515_v56 = vrot.slane %v510_v55, %v190_v51  ;;  %v523_v57 = vrot.slane %v510_v55, %v198_v3 }
 0x239   :  { %1235 = vmatprep.subr.bf16.mxu1 %v2155_v58  ;;  %1317 = vmatprep.subr.bf16.mxu0 %v2158_v60  ;;  %v519_v58 = vrot.slane %v510_v55, %v194_v53  ;;  %v527_v60 = vrot.slane %v510_v55, %v202_v54 }
 0x23c   :  { %1236 = vmatpush1.bf16.msra.mxu1 %v2153_v61  ;;  %1318 = vmatpush1.bf16.msra.mxu0 %v2156_v62 }
 0x23d   :  { %1237 = vmatprep.subr.bf16.mxu1 %v2161_v63  ;;  %1319 = vmatprep.subr.bf16.mxu0 %v2164_v0 }
 0x240   :  { %1238 = vmatpush1.bf16.msra.mxu1 %v2159_v1  ;;  %1320 = vmatpush1.bf16.msra.mxu0 %v2162_v2 }
 0x241   :  { %1239 = vmatprep.subr.bf16.mxu1 %v2167_v4  ;;  %1321 = vmatprep.subr.bf16.mxu0 %v2170_v5 }
 0x244   :  { %1240 = vmatpush1.bf16.msra.mxu1 %v2165_v6  ;;  %1322 = vmatpush1.bf16.msra.mxu0 %v2168_v7 }
 0x245   :  { %1241 = vmatprep.subr.bf16.mxu1 %v2173_v9  ;;  %1323 = vmatprep.subr.bf16.mxu0 %v2176_v10 }
 0x248   :  { %1242 = vmatpush1.bf16.msra.mxu1 %v2171_v11  ;;  %1324 = vmatpush1.bf16.msra.mxu0 %v2174_v12 }
 0x249   :  { %1243 = vmatprep.subr.bf16.mxu1 %v2179_v14  ;;  %1325 = vmatprep.subr.bf16.mxu0 %v2182_v15  ;;  %v1854_v15 = vld [vmem:[%s2485_s8] ss:$0 sm:$0xff] }
 0x24c   :  { %1244 = vmatpush1.bf16.msra.mxu1 %v2177_v16  ;;  %1326 = vmatpush1.bf16.msra.mxu0 %v2180_v17 }
 0x24d   :  { %1890 = vmatprep.subr.bf16.mxu1 %v2183_v52  ;;  %1912 = vmatprep.subr.bf16.mxu0 %v2184_v19 }
 0x24f   :  { %1246 = vmatmul.mubr.bf16.vlgmr.msra.gmra.mrb[4].mxu1 %v380_v22  ;;  %1328 = vmatmul.mubr.bf16.vlgmr.msra.gmra.mrb[8].mxu0 %v380_v22 }
 0x250   :  { %1891 = vmatpush3.bf16.msra.mxu1 %v2185_v20  ;;  %1913 = vmatpush3.bf16.msra.mxu0 %v2186_v21 }
 0x251   :  { %1892 = vmatprep.subr.bf16.mxu1 %v2187_v59  ;;  %1914 = vmatprep.subr.bf16.mxu0 %v2188_v23 }
 0x254   :  { %1893 = vmatpush3.bf16.msra.mxu1 %v2189_v24  ;;  %1915 = vmatpush3.bf16.msra.mxu0 %v2190_v25 }
 0x255   :  { %1894 = vmatprep.subr.bf16.mxu1 %v2191_v26  ;;  %1916 = vmatprep.subr.bf16.mxu0 %v2192_v27 }
 0x258   :  { %1895 = vmatpush3.bf16.msra.mxu1 %v2193_v28  ;;  %1917 = vmatpush3.bf16.msra.mxu0 %v2194_v29 }
 0x259   :  { %1896 = vmatprep.subr.bf16.mxu1 %v2195_v30  ;;  %1918 = vmatprep.subr.bf16.mxu0 %v2196_v31 }
 0x25c   :  { %1897 = vmatpush3.bf16.msra.mxu1 %v2197_v32  ;;  %1919 = vmatpush3.bf16.msra.mxu0 %v2198_v33 }
 0x25d   :  { %1898 = vmatprep.subr.bf16.mxu1 %v2199_v34  ;;  %1920 = vmatprep.subr.bf16.mxu0 %v2200_v35 }
 0x260   :  { %1899 = vmatpush3.bf16.msra.mxu1 %v2201_v36  ;;  %1921 = vmatpush3.bf16.msra.mxu0 %v2202_v37 }
 0x261   :  { %1900 = vmatprep.subr.bf16.mxu1 %v2203_v38  ;;  %1922 = vmatprep.subr.bf16.mxu0 %v2204_v39 }
 0x264   :  { %1901 = vmatpush3.bf16.msra.mxu1 %v2205_v40  ;;  %1923 = vmatpush3.bf16.msra.mxu0 %v2206_v41 }
 0x265   :  { %1902 = vmatprep.subr.bf16.mxu1 %v2207_v42  ;;  %1924 = vmatprep.subr.bf16.mxu0 %v2208_v43 }
 0x268   :  { %1903 = vmatpush3.bf16.msra.mxu1 %v2209_v44  ;;  %1925 = vmatpush3.bf16.msra.mxu0 %v2210_v45 }
 0x269   :  { %1904 = vmatprep.subr.bf16.mxu1 %v2211_v46  ;;  %1926 = vmatprep.subr.bf16.mxu0 %v2212_v47 }
 0x26c   :  { %1905 = vmatpush3.bf16.msra.mxu1 %v2213_v48  ;;  %1927 = vmatpush3.bf16.msra.mxu0 %v2214_v49 }
 0x322   :  { %v1247_v61 = vpop.f32.mrb[4].mxu1  ;;  %v1329_v62 = vpop.f32.mrb[8].mxu0 }
 0x323   :  { %v1942_v63 = vadd.f32 %v1247_v61, %v515_v56  ;;  %v1944_v0 = vadd.f32 %v1329_v62, %v523_v57  ;;  %v1249_v1 = vpop.f32.mrb[5].mxu1  ;;  %v1331_v2 = vpop.f32.mrb[9].mxu0 }
 0x324   :  { %v1943_v4 = vadd.f32 %v1249_v1, %v519_v58  ;;  %v1945_v5 = vadd.f32 %v1331_v2, %v527_v60  ;;  %v1251_v6 = vpop.f32.mrb[6].mxu1  ;;  %v1333_v7 = vpop.f32.mrb[10].mxu0 }
 0x325   :  { %v1336_v51 = vmax.f32 %v1942_v63, 0.0  ;;  %v1338_v8 = vmax.f32 %v1944_v0, 0.0  ;;  %v1252_v9 = vpop.f32.mrb[7].mxu1  ;;  %v1334_v3 = vpop.f32.mrb[11].mxu0 }
 0x326   :  { %v1337_v10 = vmax.f32 %v1943_v4, 0.0  ;;  %v1339_v11 = vmax.f32 %v1945_v5, 0.0 }
 0x327   :  { %v1340_v50 = vpack.c.bf16 %v1336_v51, %v1336_v51  ;;  %v1342_v54 = vpack.c.bf16 %v1338_v8, %v1338_v8 }
 0x328   :  { %v1341_v53 = vpack.c.bf16 %v1337_v10, %v1337_v10  ;;  %v1343_v12 = vpack.c.bf16 %v1339_v11, %v1339_v11 }
 0x32a   :  { %1639 = vmatprep.mubr.bf16.mxu1 %v1341_v53  ;;  %1679 = vmatprep.mubr.bf16.mxu0 %v1343_v12 }
 0x32b   :  { %1640 = vmatmul.mubr.bf16.vlgmr.msra.gmra.mrb[8].mxu1 %v1340_v50  ;;  %1680 = vmatmul.mubr.bf16.vlgmr.msra.gmra.mrb[12].mxu0 %v1342_v54 }
 0x3fe   :  { %v1906_v13 = vpop.f32.mrb[8].mxu1  ;;  %v1928_v14 = vpop.f32.mrb[12].mxu0 }
 0x3ff   :  { %v1907_v16 = vpop.f32.mrb[9].mxu1  ;;  %v1929_v17 = vpop.f32.mrb[13].mxu0 }
 0x400   :  { %v1908_v18 = vadd.f32 %v1907_v16, %v1906_v13  ;;  %v1930_v52 = vadd.f32 %v1929_v17, %v1928_v14  ;;  %v1909_v19 = vpop.f32.mrb[10].mxu1  ;;  %v1931_v20 = vpop.f32.mrb[14].mxu0 }
 0x401   :  { %v1910_v21 = vpop.f32.mrb[11].mxu1  ;;  %v1932_v22 = vpop.f32.mrb[15].mxu0 }
 0x402   :  { %v1642_v59 = vadd.f32 %v1908_v18, %v1854_v15 }
 0x404   :  { %v1682_v23 = vadd.f32 %v1930_v52, %v1642_v59 }
 0x406   :  { %1687 = vst [vmem:[#allocation9] sm:$0x3] %v1682_v23 }
 0x407   :  { %2292 = shalt.err (!%p2289_p0)
}
 0x408   :  { %s2293_s17 = scalar_lea.hbm %s2486_s9, 32 }
 0x409   :  { %p2294_p1 = scmp.ne.s32.totalorder %s2486_s9, %s2293_s17  ;;  %p2297_p2 = scmp.lt.u32.totalorder %s2293_s17, %s2486_s9 }
 0x40b   :  { %p2299_p3 = pnand %p2297_p2, %p2294_p1 }
 0x40d   :  { %2302 = shalt.err (!%p2299_p3)
}
 0x40e   :  { %1697 = dma.vmem_to_hbm [thread:$0]  %s1695_s14, 32, %s2486_s9, [#allocation5]  }
 0x40f   :  { %2307 = dma.done.wait [#allocation5], 32  }
 0x410   :  { %2308 = vsyncadd [#allocation5], 4294967264 }
 0x411   :  { %1701 = vsyncpa [#allocation4], 1 }
 0x412   :  { %1702 = vsyncpa [#allocation7], 1 }
 0x413   :  { %1703 = vsyncpa [#allocation5], 1 }

</bundles_post_ra>
